<compile_context>
chip_gen: v7x
topology: tpu7x:2x2x1
jax: 0.10.0
libtpu: 0.0.40
codegen_flags: <defaults>
</compile_context>

<pallas_src>
import functools

import jax
import jax.numpy as jnp
import numpy as np
from jax.experimental import pallas as pl
from jax.experimental.pallas import tpu as pltpu


def _round_up(x, m):
    return ((x + m - 1) // m) * m


def _ctc_argmax_kernel(emission_ref, idx_ref, *, compare_f32, nan_guard):
    """Per-time-step argmax over the class axis (first-occurrence tie-break).

    emission_ref: (tile_t, C) block of the emission matrix.
    idx_ref:      (1, tile_t) int32 lane-dense output row.
    """
    e = emission_ref[...]
    if compare_f32 and e.dtype != jnp.float32:
        # Narrow-float inputs (bf16) are upcast only on chips without a bf16
        # VPU datapath (v5e and earlier); v6e/v7x compare natively in bf16,
        # halving vreg pressure and input VMEM.
        e = e.astype(jnp.float32)
    if nan_guard:
        # Treat NaN as +inf so argmax lands on a real column (keeps the host
        # label lookup in range); matches torch.argmax for all-finite inputs.
        e = jnp.where(e != e, jnp.inf, e)

    rows, ncls = e.shape
    m = jnp.max(e, axis=-1, keepdims=True)                        # (rows, 1)
    col = jax.lax.broadcasted_iota(jnp.int32, (rows, ncls), 1)    # (rows, C)
    big = jnp.int32(jnp.iinfo(jnp.int32).max)
    cand = jnp.where(e == m, col, big)
    idx_col = jnp.min(cand, axis=-1)                              # (rows,) first max
    # Lane-dense store: relayout the column-oriented reduction result to a
    # (1, rows) row (XLU relayout, hidden under the output DMA) so stores are
    # full-lane vst's instead of masked partial stores.
    idx_ref[...] = idx_col.reshape(1, rows)


def _choose_tile_t(T, C, itemsize,
                   target_block_bytes=4 * 1024 * 1024,
                   vmem_budget_bytes=12 * 1024 * 1024):
    """Pick the time-tile size with lane/sublane-padding-aware VMEM accounting.

    Each input row occupies ceil(C/128)*128 lanes in VMEM regardless of C
    (4x the naive estimate for C=32 f32); the lane-dense (1, tile_t) output
    block is ~tile_t*4 bytes.  Budget = 2 in-flight input + 2 output buffers,
    kept under ~12 MiB so it fits v5e's 16 MiB scoped-VMEM default with
    headroom (v6e: 32 MiB scoped / 128 MiB phys; v7x: 32 MiB / 64 MiB phys),
    while ~4 MiB blocks amortize the ~0.35 us per-grid-step overhead.
    """
    lane_c = _round_up(C, 128)
    in_row_bytes = lane_c * itemsize
    rows = max(int(target_block_bytes // in_row_bytes), 128)
    while rows > 128 and 2 * rows * (in_row_bytes + 4) > vmem_budget_bytes:
        rows //= 2
    if rows >= T:
        return _round_up(T, 8)                 # single block covers all of T
    rows = max((rows // 128) * 128, 128)       # multi-tile: lane-aligned tiles
    # v7x megacore: prefer 2 balanced tiles over 1 full + 1 ragged tile so the
    # "parallel" grid axis feeds both TensorCores.
    half = _round_up((T + 1) // 2, 128)
    if half < rows:
        rows = half
    return rows


def _compare_in_f32(dtype):
    """True if comparisons should run in f32 instead of the input dtype."""
    dtype = np.dtype(dtype)
    if dtype == np.dtype(jnp.float32) or not jnp.issubdtype(dtype, jnp.floating):
        return False
    if dtype == np.dtype(jnp.bfloat16):
        try:
            kind = jax.devices()[0].device_kind.lower()
        except Exception:
            return True
        # v6e / v7x have a bf16 VALU datapath; v5e and earlier do not.
        return not ("v6" in kind or "v7" in kind or "7x" in kind)
    return True  # f16 etc.


@functools.lru_cache(maxsize=None)
def _build_ctc_argmax(t_pad, C, tile_t, dtype_name, compare_f32, nan_guard):
    """Build (and cache) the jitted pallas_call for one shape bucket."""
    itemsize = np.dtype(dtype_name).itemsize
    num_tiles = t_pad // tile_t

    lane_c = _round_up(C, 128)
    in_block_bytes = tile_t * lane_c * itemsize
    out_block_bytes = _round_up(tile_t, 128) * 4
    vmem_need = 2 * (in_block_bytes + out_block_bytes) + (1 << 20)
    vmem_limit = int(min(max(vmem_need, 16 << 20), 32 << 20))

    kernel = functools.partial(_ctc_argmax_kernel,
                               compare_f32=compare_f32, nan_guard=nan_guard)
    call = pl.pallas_call(
        kernel,
        out_shape=jax.ShapeDtypeStruct((num_tiles, tile_t), jnp.int32),
        grid=(num_tiles,),
        in_specs=[pl.BlockSpec((tile_t, C), lambda i: (i, 0))],
        # Lane-dense output block: last dim == full array last dim (tile_t).
        out_specs=pl.BlockSpec((1, tile_t), lambda i: (i, 0)),
        compiler_params=pltpu.CompilerParams(
            # Tiles are fully independent (no cross-tile carry): shard the T
            # axis across v7x's two TensorCores; harmless on v5e/v6e.
            dimension_semantics=("parallel",),
            vmem_limit_bytes=vmem_limit,
        ),
        cost_estimate=pl.CostEstimate(
            flops=3 * t_pad * C,
            transcendentals=0,
            bytes_accessed=t_pad * C * itemsize + t_pad * 4,
        ),
    )
    # Keep default double-buffering; VMEM is better spent on bigger tiles.
    return jax.jit(lambda e: call(e).reshape(-1))


def ctc_greedy_indices(emission, tile_t=None):
    """Runs the Pallas kernel. Returns int32 per-step argmax indices, shape (T,)."""
    emission = jnp.asarray(emission)
    T, C = emission.shape
    itemsize = np.dtype(emission.dtype).itemsize
    if tile_t is None:
        tile_t = _choose_tile_t(T, C, itemsize)
    tile_t = max(8, (int(tile_t) // 8) * 8)

    num_tiles = int(pl.cdiv(T, tile_t))
    t_pad = num_tiles * tile_t
    if t_pad != T:
        # Padded rows argmax to class 0; they are sliced off below, before the
        # host-side unique-consecutive step, so they never affect the result.
        emission = jnp.pad(emission, ((0, t_pad - T), (0, 0)))

    fn = _build_ctc_argmax(
        t_pad, C, tile_t, np.dtype(emission.dtype).name,
        bool(_compare_in_f32(emission.dtype)),
        bool(jnp.issubdtype(emission.dtype, jnp.floating)),
    )
    return fn(emission)[:T]


class GreedyCTCDecoder:
    """JAX/Pallas port of the PyTorch GreedyCTCDecoder module."""

    def __init__(self, labels, blank=0):
        self.labels = labels
        self.blank = blank

    def __call__(self, emission) -> str:
        idx = ctc_greedy_indices(emission)
        idx = np.asarray(jax.device_get(idx)).reshape(-1)
        if idx.size == 0:
            return ""
        # TODO(synk): unique_consecutive + blank filter + label string join are
        # O(T) host-side ops on the per-step indices (the string join has no
        # Pallas equivalent); the T*C-heavy argmax runs in the Pallas kernel.
        keep = np.empty(idx.shape, dtype=bool)
        keep[0] = True
        keep[1:] = idx[1:] != idx[:-1]
        keep &= idx != self.blank
        return "".join(self.labels[int(i)] for i in idx[keep])


def _reference_decode(emission, labels, blank):
    indices = np.argmax(emission, axis=-1)
    uniq = [indices[0]] + [indices[t] for t in range(1, len(indices))
                           if indices[t] != indices[t - 1]]
    return "".join(labels[int(i)] for i in uniq if i != blank)


if __name__ == "__main__":
    # 32 labels: blank ('-') + 26 letters + 5 digits
    labels = "-abcdefghijklmnopqrstuvwxyz01234"
    blank = 0
    decoder = GreedyCTCDecoder(labels, blank=blank)

    k1, k2 = jax.random.split(jax.random.PRNGKey(0))

    # Primary check at the module's small shape: emission [seq=8, vocab=32].
    emission = jax.random.normal(k1, (8, len(labels)), dtype=jnp.float32)
    transcript = decoder(emission)
    ref = _reference_decode(np.asarray(emission), labels, blank)
    assert transcript == ref, f"mismatch: kernel={transcript!r} ref={ref!r}"

    # Secondary check: exercise the multi-tile grid + time-padding path
    # (explicit tile_t=128 -> 3 tiles) and the auto single-block path.
    em2 = jax.random.normal(k2, (300, len(labels)), dtype=jnp.float32)
    idx2 = ctc_greedy_indices(em2, tile_t=128)
    jax.block_until_ready(idx2)
    np.testing.assert_array_equal(np.asarray(idx2),
                                  np.argmax(np.asarray(em2), axis=-1))
    assert decoder(em2) == _reference_decode(np.asarray(em2), labels, blank)

    print("KERNEL_OK")
</pallas_src>

<mosaic_0001>
module attributes {stable_mosaic.version = 11 : i64} {
  func.func @_ctc_argmax_kernel(%arg0: i32, %arg1: memref<8x32xf32, #tpu.memory_space<vmem>>, %arg2: memref<1x8xi32, #tpu.memory_space<vmem>>) attributes {dimension_semantics = [#tpu.dimension_semantics<parallel>], iteration_bounds = array<i64: 1>, scalar_prefetch = 0 : i64, scratch_operands = 0 : i64, tpu.core_type = #tpu.core_type<tc>, window_params = [{transform_indices = @transform_0, window_bounds = array<i64: 8, 32>}, {transform_indices = @transform_1, window_bounds = array<i64: 1, 8>}]} {
    %c0 = arith.constant 0 : index
    %c0_0 = arith.constant 0 : index
    %0 = vector.load %arg1[%c0, %c0_0] : memref<8x32xf32, #tpu.memory_space<vmem>>, vector<8x32xf32>
    %1 = arith.cmpf one, %0, %0 : vector<8x32xf32>
    %cst = arith.constant 0x7F800000 : f32
    %2 = vector.broadcast %cst : f32 to vector<8x32xf32>
    %3 = arith.select %1, %2, %0 : vector<8x32xi1>, vector<8x32xf32>
    %cst_1 = arith.constant dense<0xFF800000> : vector<8xf32>
    %4 = vector.multi_reduction <maximumf>, %3, %cst_1 [1] : vector<8x32xf32> to vector<8xf32>
    %5 = vector.shape_cast %4 : vector<8xf32> to vector<8x1xf32>
    %6 = tpu.iota {dimensions = array<i32: 1>} : vector<8x32xi32>
    %7 = vector.broadcast %5 : vector<8x1xf32> to vector<8x32xf32>
    %8 = arith.cmpf oeq, %3, %7 : vector<8x32xf32>
    %c2147483647_i32 = arith.constant 2147483647 : i32
    %9 = vector.broadcast %c2147483647_i32 : i32 to vector<8x32xi32>
    %10 = arith.select %8, %6, %9 : vector<8x32xi1>, vector<8x32xi32>
    %cst_2 = arith.constant dense<2147483647> : vector<8xi32>
    %11 = vector.multi_reduction <minsi>, %10, %cst_2 [1] : vector<8x32xi32> to vector<8xi32>
    %12 = vector.shape_cast %11 : vector<8xi32> to vector<1x8xi32>
    %c0_3 = arith.constant 0 : index
    %c0_4 = arith.constant 0 : index
    %13 = vector.load %arg2[%c0_3, %c0_4] : memref<1x8xi32, #tpu.memory_space<vmem>>, vector<1x8xi32>
    tpu.vector_store %arg2[%c0_3, %c0_4], %12 {strides = array<i32>} : memref<1x8xi32, #tpu.memory_space<vmem>>, vector<1x8xi32>,
    return
  }
  func.func @transform_0(%arg0: i32) -> (i32, i32) {
    %c0_i32 = arith.constant 0 : i32
    %c0_i32_0 = arith.constant 0 : i32
    return %arg0, %c0_i32 : i32, i32
  }
  func.func @transform_1(%arg0: i32) -> (i32, i32) {
    %c0_i32 = arith.constant 0 : i32
    %c0_i32_0 = arith.constant 0 : i32
    return %arg0, %c0_i32 : i32, i32
  }
}

</mosaic_0001>

<bundles_post_ra>
// kernel: _lambda_.1
= control target key start
LH: loop header
LB: loop body
LE: loop exit
PB: predicated region body
PF: predicated region fallthrough
CT: control target
= control target key end

     0   :  { %6 = vsyncpa [#allocation3], 0  ;;  %s154_s0 = inlined_call_operand.hbm [shape: f32[8,32], index: 0, kind: input, shape index: {}]   ;;  %s155_s1 = inlined_call_operand.hbm [shape: s32[1,8], index: 1, kind: output, shape index: {}]  }
   0x1   :  { %7 = vsyncpa [#allocation4], 0  ;;  %s118_s6 = smov [#allocation2]   ;;  %s70_s10 = scalar_lea.hbm %s154_s0, 128 }
   0x2   :  { %s14_s7 = sshll.u32 %s118_s6, 4  ;;  %p71_p0 = scmp.ne.s32.totalorder %s154_s0, %s70_s10  ;;  %s15_s7 = int_to_ptr.vmem [resolvable:$true] %s14_s7 }
   0x3   :  { %p74_p1 = scmp.lt.u32.totalorder %s70_s10, %s154_s0 }
   0x5   :  { %p76_p2 = pnand %p74_p1, %p71_p0 }
   0x7   :  { %79 = shalt.err (!%p76_p2)
}
   0x8   :  { %s80_s15 = scalar_lea.vmem %s15_s7, 128  ;;  %p85_p4 = scmp.lt.s32.totalorder %s15_s7, %s15_s7 }
   0x9   :  { %p81_p3 = scmp.ne.s32.totalorder %s15_s7, %s80_s15  ;;  %p86_p5 = scmp.lt.s32.totalorder %s80_s15, %s80_s15 }
   0xb   :  { %p87_p6 = por %p86_p5, %p85_p4 }
   0xd   :  { %p88_p7 = pnand %p87_p6, %p81_p3 }
   0xf   :  { %91 = shalt.err (!%p88_p7)
}
  0x10   :  { %17 = dma.hbm_to_vmem [thread:$0]  %s154_s0, 128, %s15_s7, [#allocation3]  }
  0x11   :  { %114 = dma.done.wait [#allocation3], 128  }
  0x12   :  { %115 = vsyncadd [#allocation3], 4294967168  ;;  %v21_v0 = vld [vmem:[#allocation2] sm:$0xff]  ;;  %vm24_vm0 = vcmask 261120   ;;  %v28_v3 = vlaneseq  ;;  %s119_s0 = smov [#allocation5]   ;;  %vm51_vm4 = vcmask 57344  }
  0x13   :  { %vm22_vm1 = vcmp.ne.f32.partialorder %v21_v0, %v21_v0  ;;  %s59_s18 = sshll.u32 %s119_s0, 4  ;;  %s60_s18 = int_to_ptr.vmem [resolvable:$true] %s59_s18 }
  0x14   :  { %v23_v1 = vsel %vm22_vm1, inf, %v21_v0  ;;  %v29_v4 = vand.u32 127, %v28_v3  ;;  %v48_v14 = vshrl.u32 %v28_v3, 7  ;;  %s92_s19 = scalar_lea.vmem %s60_s18, 16  ;;  %s96_s20 = scalar_lea.vmem %s60_s18, 32 }
  0x15   :  { %v25_v2 = vsel %vm24_vm0, %v23_v1, -inf  ;;  %p93_p8 = scmp.ne.s32.totalorder %s60_s18, %s92_s19  ;;  %p97_p9 = scmp.lt.s32.totalorder %s60_s18, %s60_s18 }
  0x16   :  { %26 = vmax.xlane.f32.xlu0 %v25_v2  ;;  %v49_v17 = vsub.s32 %v29_v4, %v48_v14  ;;  %p98_p10 = scmp.lt.s32.totalorder %s96_s20, %s92_s19 }
  0x18   :  { %p99_p11 = por %p98_p10, %p97_p9 }
  0x1a   :  { %p100_p12 = pnand %p99_p11, %p93_p8 }
  0xa3   :  { %v27_v5 = vpop.xlane.xlu0 %26 }
  0xa4   :  { %vm30_vm2 = vcmp.eq.f32.partialorder %v23_v1, %v27_v5 }
  0xa5   :  { %v31_v6 = vsel %vm30_vm2, %v29_v4, 2147483647 }
  0xa6   :  { %v32_v7 = vsel %vm24_vm0, %v31_v6, 2147483647 }
  0xa7   :  { %v34_v8 = vshra.s32 %v32_v7, 16  ;;  %v33_v10 = vand.u32 65535, %v32_v7 }
  0xa9   :  { %v36_v9 = vcvt.s32.f32 %v34_v8  ;;  %v35_v12 = vcvt.s32.f32 %v33_v10 }
  0xab   :  { %37 = vmin.xlane.f32.xlu0 %v36_v9 }
 0x138   :  { %v38_v11 = vpop.xlane.xlu0 %37 }
 0x139   :  { %vm39_vm3 = vcmp.eq.f32.partialorder %v36_v9, %v38_v11  ;;  %v44_v15 = vcvt.f32.s32 %v38_v11 }
 0x13a   :  { %v40_v13 = vsel %vm39_vm3, %v35_v12, inf }
 0x13b   :  { %41 = vmin.xlane.f32.xlu1 %v40_v13  ;;  %v45_v18 = vshll.u32 %v44_v15, 16 }
 0x1c8   :  { %v42_v16 = vpop.xlane.xlu1 %41 }
 0x1c9   :  { %v43_v19 = vcvt.f32.s32 %v42_v16 }
 0x1cb   :  { %v46_v20 = vadd.s32 %v45_v18, %v43_v19 }
 0x1cd   :  { %v50_v21 = vrot.slane %v46_v20, %v49_v17 }
 0x1cf   :  { %52 = vst.msk [vmem:[#allocation5] sm:$0x1] %vm51_vm4, %v50_v21 }
 0x1d0   :  { %103 = shalt.err (!%p100_p12)
}
 0x1d1   :  { %s104_s23 = scalar_lea.hbm %s155_s1, 16 }
 0x1d2   :  { %p105_p13 = scmp.ne.s32.totalorder %s155_s1, %s104_s23  ;;  %p108_p0 = scmp.lt.u32.totalorder %s104_s23, %s155_s1 }
 0x1d4   :  { %p110_p1 = pnand %p108_p0, %p105_p13 }
 0x1d6   :  { %113 = shalt.err (!%p110_p1)
}
 0x1d7   :  { %62 = dma.vmem_to_hbm [thread:$0]  %s60_s18, 16, %s155_s1, [#allocation4]  }
 0x1d8   :  { %116 = dma.done.wait [#allocation4], 16  }
 0x1d9   :  { %117 = vsyncadd [#allocation4], 4294967280 }
 0x1da   :  { %66 = vsyncpa [#allocation3], 1 }
 0x1db   :  { %67 = vsyncpa [#allocation4], 1 }

</bundles_post_ra>
